<compile_context>
chip_gen: v7x
topology: tpu7x:2x2x1
jax: 0.10.0
libtpu: 0.0.40
codegen_flags: <defaults>
</compile_context>

<pallas_src>
import functools

import numpy as np
import jax
import jax.numpy as jnp
from jax import lax
from jax.experimental import pallas as pl
from jax.experimental.pallas import tpu as pltpu

BN_EPS = 0.8          # nn.BatchNorm1d(layer_size[0], 0.8) -> eps=0.8
LEAKY_SLOPE = 0.2
VMEM_LIMIT_BYTES = 32 * 1024 * 1024   # above v5e's 16 MiB scoped default, safe on v6e/v7x


def _round_up(x, m):
    return (x + m - 1) // m * m


# --------------------------------------------------------------------------
# Pass 1: per-tile BN partial sums of h = x @ W1  (h itself never hits HBM).
# --------------------------------------------------------------------------
def linear1_stats_kernel(x_ref, w1_ref, stats_ref):
    # x_ref: (TILE_B, D) bf16, w1_ref: (D, H1p) bf16 -> f32 accumulation.
    h = jnp.dot(x_ref[...], w1_ref[...], preferred_element_type=jnp.float32)
    s1 = jnp.sum(h, axis=0, keepdims=True)        # (1, H1p)
    s2 = jnp.sum(h * h, axis=0, keepdims=True)    # (1, H1p)
    stats_ref[...] = jnp.concatenate([s1, s2], axis=0)[None]   # (1, 2, H1p)


# --------------------------------------------------------------------------
# Pass 2: recompute h = x @ W1, folded BN (1 FMA), LeakyReLU, Linear-2.
# --------------------------------------------------------------------------
def bn_act_linear2_kernel(x_ref, w1_ref, scale_ref, shift_ref, w2_ref, b2_ref,
                          o_ref):
    h = jnp.dot(x_ref[...], w1_ref[...], preferred_element_type=jnp.float32)
    h_bn = h * scale_ref[...] + shift_ref[...]                 # folded BN
    a = jnp.where(h_bn > 0, h_bn, LEAKY_SLOPE * h_bn)          # LeakyReLU(0.2), f32
    o_ref[...] = (jnp.dot(a.astype(jnp.bfloat16), w2_ref[...],
                          preferred_element_type=jnp.float32)
                  + b2_ref[...]).astype(o_ref.dtype)


# --------------------------------------------------------------------------
# One-time parameter preparation (hoisted out of the per-call forward).
# --------------------------------------------------------------------------
def prepare_params(w1, gamma, beta, w2, b2):
    """Pad feature dims to multiples of 128 and pre-cast MXU operands to bf16.

    Call ONCE and reuse across forwards; this removes per-call weight
    re-padding HBM traffic.  Linear-1's bias is intentionally not needed --
    it cancels exactly under training-mode BatchNorm.
    """
    D, H1 = w1.shape
    H2 = w2.shape[1]
    H1p = _round_up(H1, 128)
    H2p = _round_up(H2, 128)
    w1_b = jnp.zeros((D, H1p), jnp.bfloat16).at[:, :H1].set(w1.astype(jnp.bfloat16))
    gamma_p = jnp.ones((1, H1p), jnp.float32).at[:, :H1].set(gamma)
    beta_p = jnp.zeros((1, H1p), jnp.float32).at[:, :H1].set(beta)
    w2_b = jnp.zeros((H1p, H2p), jnp.bfloat16).at[:H1, :H2].set(w2.astype(jnp.bfloat16))
    b2_p = jnp.zeros((1, H2p), jnp.float32).at[:, :H2].set(b2)
    return (w1_b, gamma_p, beta_p, w2_b, b2_p), H2


def _pick_tile_b(B, D, H1p, H2p, out_itemsize, budget_bytes):
    """Largest batch tile fitting a VMEM budget (everything counted x2 for
    BlockSpec double buffering, plus in-kernel f32 h / activation temps)."""
    resident = 2 * (D * H1p * 2 + H1p * H2p * 2 + 2 * H1p * 4 + H2p * 4)
    per_row = 2 * (2 * D + out_itemsize * H2p) + 10 * H1p
    avail = max(budget_bytes - resident, 8 * per_row)
    tile = min(max(avail // per_row, 8), 1024)
    return int(tile // 8 * 8)


# --------------------------------------------------------------------------
# Forward
# --------------------------------------------------------------------------
def cpm_generator_forward(x, w1_b, gamma_p, beta_p, w2_b, b2_p, *,
                          out_features,
                          vmem_budget_bytes=20 * 1024 * 1024,
                          out_dtype=jnp.float32):
    """x: (B, D) f32; padded/bf16 weights from prepare_params()."""
    B, D = x.shape
    H1p = w1_b.shape[1]
    H2p = w2_b.shape[1]
    out_itemsize = np.dtype(out_dtype).itemsize

    # Batch tile: VMEM-budgeted, and capped at ceil(B/2) so the parallel grid
    # axis has >= 2 steps whenever B > 8 (keeps both v7x TensorCores busy).
    tile_b = _pick_tile_b(B, D, H1p, H2p, out_itemsize, vmem_budget_bytes)
    tile_b_eff = max(8, min(tile_b, _round_up(pl.cdiv(B, 2), 8)))
    num_tiles = pl.cdiv(B, tile_b_eff)
    B_pad = num_tiles * tile_b_eff

    # Padded batch rows are zero; with no Linear-1 bias they contribute
    # exactly zero to the BN partial sums and are sliced off the output.
    x_p = jnp.zeros((B_pad, D), jnp.bfloat16).at[:B].set(x.astype(jnp.bfloat16))

    cparams = pltpu.CompilerParams(
        dimension_semantics=("parallel",),
        vmem_limit_bytes=VMEM_LIMIT_BYTES)

    # ---- Pass 1: BN partial sums of h = x @ W1 (h never written to HBM) ----
    stats = pl.pallas_call(
        linear1_stats_kernel,
        out_shape=jax.ShapeDtypeStruct((num_tiles, 2, H1p), jnp.float32),
        grid=(num_tiles,),
        in_specs=[
            pl.BlockSpec((tile_b_eff, D), lambda i: (i, 0)),   # x tile
            pl.BlockSpec((D, H1p), lambda i: (0, 0)),          # w1 (resident)
        ],
        out_specs=pl.BlockSpec((1, 2, H1p), lambda i: (i, 0, 0)),
        compiler_params=cparams,
    )(x_p, w1_b)

    # ---- Tiny glue (plain JAX): reduce partials, fold BN into scale/shift ----
    # NOTE: var = E[h^2] - E[h]^2 (single sweep).  Cancellation is tolerable
    # here because eps=0.8 dominates and var is clamped at 0.
    tot = jnp.sum(stats, axis=0)                         # (2, H1p)
    mean = tot[0:1] / B                                  # (1, H1p)
    var = jnp.maximum(tot[1:2] / B - mean * mean, 0.0)   # biased batch variance
    scale = gamma_p * lax.rsqrt(var + BN_EPS)            # (1, H1p)
    shift = beta_p - mean * scale                        # (1, H1p)

    # ---- Pass 2: recompute h, BN-apply + LeakyReLU + Linear-2 ----
    out_p = pl.pallas_call(
        bn_act_linear2_kernel,
        out_shape=jax.ShapeDtypeStruct((B_pad, H2p), out_dtype),
        grid=(num_tiles,),
        in_specs=[
            pl.BlockSpec((tile_b_eff, D), lambda i: (i, 0)),   # x tile
            pl.BlockSpec((D, H1p), lambda i: (0, 0)),          # w1 (resident)
            pl.BlockSpec((1, H1p), lambda i: (0, 0)),          # scale
            pl.BlockSpec((1, H1p), lambda i: (0, 0)),          # shift
            pl.BlockSpec((H1p, H2p), lambda i: (0, 0)),        # w2 (resident)
            pl.BlockSpec((1, H2p), lambda i: (0, 0)),          # b2
        ],
        out_specs=pl.BlockSpec((tile_b_eff, H2p), lambda i: (i, 0)),
        compiler_params=cparams,
    )(x_p, w1_b, scale, shift, w2_b, b2_p)

    return out_p[:B, :out_features]


def init_params(key, lsd_dim, layer_size):
    """Deterministic init matching PyTorch default Linear init ranges."""
    L0, L1 = layer_size
    k1, k2, k3, k4 = jax.random.split(key, 4)

    bound1 = 1.0 / (lsd_dim ** 0.5)
    w1 = jax.random.uniform(k1, (lsd_dim, L0), jnp.float32, -bound1, bound1)
    b1 = jax.random.uniform(k2, (1, L0), jnp.float32, -bound1, bound1)

    gamma = jnp.ones((1, L0), jnp.float32)   # BatchNorm affine defaults
    beta = jnp.zeros((1, L0), jnp.float32)

    bound2 = 1.0 / (L0 ** 0.5)
    w2 = jax.random.uniform(k3, (L0, L1), jnp.float32, -bound2, bound2)
    b2 = jax.random.uniform(k4, (1, L1), jnp.float32, -bound2, bound2)

    return w1, b1, gamma, beta, w2, b2


if __name__ == "__main__":
    # Small shapes consistent with the module's forward (x: [batch, lsd_dim]).
    batch = 8
    lsd_dim = 32
    layer_size = (64, 32)

    key = jax.random.PRNGKey(0)
    kx, kp = jax.random.split(key)
    x = jax.random.normal(kx, (batch, lsd_dim), jnp.float32)
    w1, b1, gamma, beta, w2, b2 = init_params(kp, lsd_dim, layer_size)

    # Pad / cast weights ONCE (hoisted out of the per-call forward).
    (w1_b, gamma_p, beta_p, w2_b, b2_p), out_features = prepare_params(
        w1, gamma, beta, w2, b2)

    fwd = jax.jit(functools.partial(cpm_generator_forward,
                                    out_features=out_features))
    out = fwd(x, w1_b, gamma_p, beta_p, w2_b, b2_p)   # b1 unused: cancels under BN
    jax.block_until_ready(out)

    # Pure-JAX f32 reference of the exact PyTorch math (b1 included; it cancels).
    h = x @ w1 + b1
    m = h.mean(0, keepdims=True)
    v = ((h - m) ** 2).mean(0, keepdims=True)
    hbn = (h - m) / jnp.sqrt(v + BN_EPS) * gamma + beta
    a = jnp.where(hbn > 0, hbn, LEAKY_SLOPE * hbn)
    ref = a @ w2 + b2

    # bf16 MXU operands -> relaxed tolerance.
    assert out.shape == ref.shape, "shape mismatch vs reference"
    assert jnp.allclose(out, ref, atol=5e-2, rtol=5e-2), "mismatch vs reference"

    print("KERNEL_OK")
</pallas_src>

<mosaic_0001>
module attributes {stable_mosaic.version = 11 : i64} {
  func.func @linear1_stats_kernel(%arg0: i32, %arg1: memref<8x32xbf16, #tpu.memory_space<vmem>>, %arg2: memref<32x128xbf16, #tpu.memory_space<vmem>>, %arg3: memref<1x2x128xf32, #tpu.memory_space<vmem>>) attributes {dimension_semantics = [#tpu.dimension_semantics<parallel>], iteration_bounds = array<i64: 1>, scalar_prefetch = 0 : i64, scratch_operands = 0 : i64, tpu.core_type = #tpu.core_type<tc>, window_params = [{transform_indices = @transform_0, window_bounds = array<i64: 8, 32>}, {pipeline_mode = #tpu.pipeline_mode<synchronous>, transform_indices = @transform_1, window_bounds = array<i64: 32, 128>}, {transform_indices = @transform_2, window_bounds = array<i64: 1, 2, 128>}]} {
    %c0 = arith.constant 0 : index
    %c0_0 = arith.constant 0 : index
    %0 = vector.load %arg1[%c0, %c0_0] : memref<8x32xbf16, #tpu.memory_space<vmem>>, vector<8x32xbf16>
    %c0_1 = arith.constant 0 : index
    %c0_2 = arith.constant 0 : index
    %1 = vector.load %arg2[%c0_1, %c0_2] : memref<32x128xbf16, #tpu.memory_space<vmem>>, vector<32x128xbf16>
    %cst = arith.constant dense<0.000000e+00> : vector<8x128xf32>
    %2 = tpu.matmul %0, %1, %cst {dimension_numbers = #tpu.dot_dimension_numbers<[1], [0], [0], [1], [0, 0, 1, 1], [], []>} : vector<8x32xbf16>, vector<32x128xbf16>, vector<8x128xf32> -> vector<8x128xf32>
    %cst_3 = arith.constant dense<0.000000e+00> : vector<128xf32>
    %3 = vector.multi_reduction <add>, %2, %cst_3 [0] : vector<8x128xf32> to vector<128xf32>
    %4 = vector.shape_cast %3 : vector<128xf32> to vector<1x128xf32>
    %5 = arith.mulf %2, %2 : vector<8x128xf32>
    %cst_4 = arith.constant dense<0.000000e+00> : vector<128xf32>
    %6 = vector.multi_reduction <add>, %5, %cst_4 [0] : vector<8x128xf32> to vector<128xf32>
    %7 = vector.shape_cast %6 : vector<128xf32> to vector<1x128xf32>
    %8 = tpu.concatenate %4, %7 in 0 : vector<1x128xf32>, vector<1x128xf32> -> vector<2x128xf32>
    %9 = vector.shape_cast %8 : vector<2x128xf32> to vector<1x2x128xf32>
    %c0_5 = arith.constant 0 : index
    %c0_6 = arith.constant 0 : index
    %c0_7 = arith.constant 0 : index
    %10 = vector.load %arg3[%c0_5, %c0_6, %c0_7] : memref<1x2x128xf32, #tpu.memory_space<vmem>>, vector<1x2x128xf32>
    tpu.vector_store %arg3[%c0_5, %c0_6, %c0_7], %9 {strides = array<i32>} : memref<1x2x128xf32, #tpu.memory_space<vmem>>, vector<1x2x128xf32>,
    return
  }
  func.func @transform_0(%arg0: i32) -> (i32, i32) {
    %c0_i32 = arith.constant 0 : i32
    %c0_i32_0 = arith.constant 0 : i32
    return %arg0, %c0_i32 : i32, i32
  }
  func.func @transform_1(%arg0: i32) -> (i32, i32) {
    %c0_i32 = arith.constant 0 : i32
    %c0_i32_0 = arith.constant 0 : i32
    %c0_i32_1 = arith.constant 0 : i32
    return %c0_i32, %c0_i32_0 : i32, i32
  }
  func.func @transform_2(%arg0: i32) -> (i32, i32, i32) {
    %c0_i32 = arith.constant 0 : i32
    %c0_i32_0 = arith.constant 0 : i32
    %c0_i32_1 = arith.constant 0 : i32
    return %arg0, %c0_i32, %c0_i32_0 : i32, i32, i32
  }
}

module attributes {stable_mosaic.version = 11 : i64} {
  func.func @bn_act_linear2_kernel(%arg0: i32, %arg1: memref<8x32xbf16, #tpu.memory_space<vmem>>, %arg2: memref<32x128xbf16, #tpu.memory_space<vmem>>, %arg3: memref<1x128xf32, #tpu.memory_space<vmem>>, %arg4: memref<1x128xf32, #tpu.memory_space<vmem>>, %arg5: memref<128x128xbf16, #tpu.memory_space<vmem>>, %arg6: memref<1x128xf32, #tpu.memory_space<vmem>>, %arg7: memref<8x128xf32, #tpu.memory_space<vmem>>) attributes {dimension_semantics = [#tpu.dimension_semantics<parallel>], iteration_bounds = array<i64: 1>, scalar_prefetch = 0 : i64, scratch_operands = 0 : i64, tpu.core_type = #tpu.core_type<tc>, window_params = [{transform_indices = @transform_0, window_bounds = array<i64: 8, 32>}, {pipeline_mode = #tpu.pipeline_mode<synchronous>, transform_indices = @transform_1, window_bounds = array<i64: 32, 128>}, {pipeline_mode = #tpu.pipeline_mode<synchronous>, transform_indices = @transform_2, window_bounds = array<i64: 1, 128>}, {pipeline_mode = #tpu.pipeline_mode<synchronous>, transform_indices = @transform_3, window_bounds = array<i64: 1, 128>}, {pipeline_mode = #tpu.pipeline_mode<synchronous>, transform_indices = @transform_4, window_bounds = array<i64: 128, 128>}, {pipeline_mode = #tpu.pipeline_mode<synchronous>, transform_indices = @transform_5, window_bounds = array<i64: 1, 128>}, {transform_indices = @transform_6, window_bounds = array<i64: 8, 128>}]} {
    %c0 = arith.constant 0 : index
    %c0_0 = arith.constant 0 : index
    %0 = vector.load %arg1[%c0, %c0_0] : memref<8x32xbf16, #tpu.memory_space<vmem>>, vector<8x32xbf16>
    %c0_1 = arith.constant 0 : index
    %c0_2 = arith.constant 0 : index
    %1 = vector.load %arg2[%c0_1, %c0_2] : memref<32x128xbf16, #tpu.memory_space<vmem>>, vector<32x128xbf16>
    %cst = arith.constant dense<0.000000e+00> : vector<8x128xf32>
    %2 = tpu.matmul %0, %1, %cst {dimension_numbers = #tpu.dot_dimension_numbers<[1], [0], [0], [1], [0, 0, 1, 1], [], []>} : vector<8x32xbf16>, vector<32x128xbf16>, vector<8x128xf32> -> vector<8x128xf32>
    %c0_3 = arith.constant 0 : index
    %c0_4 = arith.constant 0 : index
    %3 = vector.load %arg3[%c0_3, %c0_4] : memref<1x128xf32, #tpu.memory_space<vmem>>, vector<1x128xf32>
    %4 = vector.broadcast %3 : vector<1x128xf32> to vector<8x128xf32>
    %5 = arith.mulf %2, %4 : vector<8x128xf32>
    %c0_5 = arith.constant 0 : index
    %c0_6 = arith.constant 0 : index
    %6 = vector.load %arg4[%c0_5, %c0_6] : memref<1x128xf32, #tpu.memory_space<vmem>>, vector<1x128xf32>
    %7 = vector.broadcast %6 : vector<1x128xf32> to vector<8x128xf32>
    %8 = arith.addf %5, %7 : vector<8x128xf32>
    %cst_7 = arith.constant 0.000000e+00 : f32
    %9 = vector.broadcast %cst_7 : f32 to vector<8x128xf32>
    %10 = arith.cmpf ogt, %8, %9 : vector<8x128xf32>
    %cst_8 = arith.constant 2.000000e-01 : f32
    %11 = vector.broadcast %cst_8 : f32 to vector<8x128xf32>
    %12 = arith.mulf %11, %8 : vector<8x128xf32>
    %13 = arith.select %10, %8, %12 : vector<8x128xi1>, vector<8x128xf32>
    %14 = arith.truncf %13 : vector<8x128xf32> to vector<8x128xbf16>
    %c0_9 = arith.constant 0 : index
    %c0_10 = arith.constant 0 : index
    %15 = vector.load %arg5[%c0_9, %c0_10] : memref<128x128xbf16, #tpu.memory_space<vmem>>, vector<128x128xbf16>
    %cst_11 = arith.constant dense<0.000000e+00> : vector<8x128xf32>
    %16 = tpu.matmul %14, %15, %cst_11 {dimension_numbers = #tpu.dot_dimension_numbers<[1], [0], [0], [1], [0, 0, 1, 1], [], []>} : vector<8x128xbf16>, vector<128x128xbf16>, vector<8x128xf32> -> vector<8x128xf32>
    %c0_12 = arith.constant 0 : index
    %c0_13 = arith.constant 0 : index
    %17 = vector.load %arg6[%c0_12, %c0_13] : memref<1x128xf32, #tpu.memory_space<vmem>>, vector<1x128xf32>
    %18 = vector.broadcast %17 : vector<1x128xf32> to vector<8x128xf32>
    %19 = arith.addf %16, %18 : vector<8x128xf32>
    %c0_14 = arith.constant 0 : index
    %c0_15 = arith.constant 0 : index
    %20 = vector.load %arg7[%c0_14, %c0_15] : memref<8x128xf32, #tpu.memory_space<vmem>>, vector<8x128xf32>
    tpu.vector_store %arg7[%c0_14, %c0_15], %19 {strides = array<i32>} : memref<8x128xf32, #tpu.memory_space<vmem>>, vector<8x128xf32>,
    return
  }
  func.func @transform_0(%arg0: i32) -> (i32, i32) {
    %c0_i32 = arith.constant 0 : i32
    %c0_i32_0 = arith.constant 0 : i32
    return %arg0, %c0_i32 : i32, i32
  }
  func.func @transform_1(%arg0: i32) -> (i32, i32) {
    %c0_i32 = arith.constant 0 : i32
    %c0_i32_0 = arith.constant 0 : i32
    %c0_i32_1 = arith.constant 0 : i32
    return %c0_i32, %c0_i32_0 : i32, i32
  }
  func.func @transform_2(%arg0: i32) -> (i32, i32) {
    %c0_i32 = arith.constant 0 : i32
    %c0_i32_0 = arith.constant 0 : i32
    %c0_i32_1 = arith.constant 0 : i32
    return %c0_i32, %c0_i32_0 : i32, i32
  }
  func.func @transform_3(%arg0: i32) -> (i32, i32) {
    %c0_i32 = arith.constant 0 : i32
    %c0_i32_0 = arith.constant 0 : i32
    %c0_i32_1 = arith.constant 0 : i32
    return %c0_i32, %c0_i32_0 : i32, i32
  }
  func.func @transform_4(%arg0: i32) -> (i32, i32) {
    %c0_i32 = arith.constant 0 : i32
    %c0_i32_0 = arith.constant 0 : i32
    %c0_i32_1 = arith.constant 0 : i32
    return %c0_i32, %c0_i32_0 : i32, i32
  }
  func.func @transform_5(%arg0: i32) -> (i32, i32) {
    %c0_i32 = arith.constant 0 : i32
    %c0_i32_0 = arith.constant 0 : i32
    %c0_i32_1 = arith.constant 0 : i32
    return %c0_i32, %c0_i32_0 : i32, i32
  }
  func.func @transform_6(%arg0: i32) -> (i32, i32) {
    %c0_i32 = arith.constant 0 : i32
    %c0_i32_0 = arith.constant 0 : i32
    return %arg0, %c0_i32 : i32, i32
  }
}

</mosaic_0001>

<bundles_post_ra>
// kernel: cpm_generator_forward.2
= control target key start
LH: loop header
LB: loop body
LE: loop exit
PB: predicated region body
PF: predicated region fallthrough
CT: control target
= control target key end

     0   :  { %v111_v0 = vmov 0.0   ;;  %vm112_vm0 = vmmov 0   ;;  %vm29_vm1 = vcmask 261120   ;;  %vm86_vm2 = vcmask 1040384   ;;  %s140_s1 = inlined_call_operand.vmem [shape: bf16[32,128], index: 1, kind: input, shape index: {}]   ;;  %s141_s0 = inlined_call_operand.vmem [shape: bf16[8,32], index: 0, kind: input, shape index: {}]   ;;  %s142_s2 = inlined_call_operand.vmem [shape: f32[1,2,128], index: 2, kind: output, shape index: {}]  }
   0x1   :  { %99 = vmatprep.subr.bf16.mxu0 %v111_v0  ;;  %v109_v1 = vld [vmem:[%s140_s1] sm:$0xff]   ;;  %103 = vmatprep.mubr.msk.bf16.mxu0 %vm112_vm0, %v111_v0  ;;  %v110_v2 = vld [vmem:[%s140_s1 + $0x8] sm:$0xff]  }
   0x2   :  { %100 = vmatpush3.bf16.msra.mxu0 %v109_v1  ;;  %v12_v3 = vld [vmem:[%s141_s0] sm:$0xf] }
   0x3   :  { %101 = vmatprep.subr.bf16.mxu0 %v111_v0 }
   0x6   :  { %102 = vmatpush3.bf16.msra.mxu0 %v110_v2 }
   0x9   :  { %104 = vmatmul.mubr.msk.bf16.vlgmr.msra.gmra.mrb[0].mxu0 %vm29_vm1, %v12_v3 }
  0xdc   :  { %v67_v4 = vpop.f32.mrb[0].mxu0 }
  0xdd   :  { %v73_v5 = vrot.slane %v67_v4, 4  ;;  %v79_v6 = vmul.f32 %v67_v4, %v67_v4  ;;  %v105_v7 = vpop.f32.mrb[1].mxu0 }
  0xde   :  { %v70_v8 = vpop.f32.mrb[2].mxu0 }
  0xdf   :  { %v74_v9 = vadd.f32 %v73_v5, %v67_v4  ;;  %v80_v10 = vrot.slane %v79_v6, 4  ;;  %v106_v11 = vpop.f32.mrb[3].mxu0 }
  0xe1   :  { %v75_v12 = vrot.slane %v74_v9, 2  ;;  %v81_v13 = vadd.f32 %v80_v10, %v79_v6 }
  0xe3   :  { %v76_v14 = vadd.f32 %v75_v12, %v74_v9  ;;  %v82_v15 = vrot.slane %v81_v13, 2 }
  0xe5   :  { %v77_v16 = vrot.slane %v76_v14, 1  ;;  %v83_v17 = vadd.f32 %v82_v15, %v81_v13 }
  0xe7   :  { %v84_v18 = vrot.slane %v83_v17, 1  ;;  %v78_v19 = vadd.f32 %v77_v16, %v76_v14 }
  0xe9   :  { %v85_v20 = vadd.f32 %v84_v18, %v83_v17 }
  0xeb   :  { %v87_v21 = vsel %vm86_vm2, %v78_v19, %v85_v20 }
  0xec   :  { %88 = vst [vmem:[%s142_s2] sm:$0x3] %v87_v21 }

// kernel: cpm_generator_forward.3
= control target key start
LH: loop header
LB: loop body
LE: loop exit
PB: predicated region body
PF: predicated region fallthrough
CT: control target
= control target key end

     0   :  { %11 = vsyncpa [#allocation3], 0  ;;  %s448_s0 = inlined_call_operand.vmem [shape: bf16[8,32], index: 0, kind: input, shape index: {}]   ;;  %s449_s1 = inlined_call_operand.vmem [shape: bf16[32,128], index: 1, kind: input, shape index: {}]   ;;  %s450_s2 = inlined_call_operand.vmem [shape: f32[1,128], index: 2, kind: input, shape index: {}]   ;;  %s451_s3 = inlined_call_operand.vmem [shape: f32[1,128], index: 3, kind: input, shape index: {}]   ;;  %s452_s4 = inlined_call_operand.hbm [shape: bf16[128,128], index: 4, kind: input, shape index: {}]   ;;  %s453_s5 = inlined_call_operand.vmem [shape: f32[1,128], index: 5, kind: input, shape index: {}]   ;;  %s454_s6 = inlined_call_operand.hbm [shape: f32[8,128], index: 6, kind: output, shape index: {}]  }
   0x1   :  { %12 = vsyncpa [#allocation4], 0  ;;  %s365_s21 = smov [#allocation2]   ;;  %s317_s25 = scalar_lea.hbm %s452_s4, 1024 }
   0x2   :  { %s26_s22 = sshll.u32 %s365_s21, 4  ;;  %p318_p0 = scmp.ne.s32.totalorder %s452_s4, %s317_s25  ;;  %s27_s22 = int_to_ptr.vmem [resolvable:$true] %s26_s22 }
   0x3   :  { %p321_p1 = scmp.lt.u32.totalorder %s317_s25, %s452_s4 }
   0x5   :  { %p323_p2 = pnand %p321_p1, %p318_p0 }
   0x7   :  { %326 = shalt.err (!%p323_p2)
}
   0x8   :  { %s327_s30 = scalar_lea.vmem %s27_s22, 1024  ;;  %p332_p4 = scmp.lt.s32.totalorder %s27_s22, %s27_s22 }
   0x9   :  { %p328_p3 = scmp.ne.s32.totalorder %s27_s22, %s327_s30  ;;  %p333_p5 = scmp.lt.s32.totalorder %s327_s30, %s327_s30 }
   0xb   :  { %p334_p6 = por %p333_p5, %p332_p4 }
   0xd   :  { %p335_p7 = pnand %p334_p6, %p328_p3 }
   0xf   :  { %338 = shalt.err (!%p335_p7)
}
  0x10   :  { %s366_s7 = smov 64   ;;  %s367_s8 = smov 4  }
  0x11   :  { %32 = dma.hbm_to_vmem [thread:$0]  %s452_s4, 1024, %s27_s22, [#allocation3], %s366_s7, %s366_s7, %s367_s8  }
  0x12   :  { %361 = dma.done.wait [#allocation3], 1024  }
  0x13   :  { %362 = vsyncadd [#allocation3], 4294966272  ;;  %v368_v0 = vmov 0.0   ;;  %vm369_vm0 = vmmov 0   ;;  %v307_v1 = vld [vmem:[%s449_s1] sm:$0xff]   ;;  %v308_v2 = vld [vmem:[%s449_s1 + $0x8] sm:$0xff]  }
  0x14   :  { %273 = vmatprep.subr.bf16.mxu0 %v368_v0  ;;  %277 = vmatprep.mubr.msk.bf16.mxu0 %vm369_vm0, %v368_v0  ;;  %v309_v3 = vld [vmem:[#allocation2] sm:$0xff]   ;;  %vm56_vm1 = vcmask 261120   ;;  %v310_v4 = vld [vmem:[#allocation2 + $0x8] sm:$0xff]   ;;  %v311_v6 = vld [vmem:[#allocation2 + $0x10] sm:$0xff]  }
  0x15   :  { %281 = vmatprep.subr.bf16.mxu1 %v368_v0  ;;  %297 = vmatprep.mubr.msk.bf16.mxu1 %vm369_vm0, %v368_v0  ;;  %v39_v5 = vld [vmem:[%s448_s0] sm:$0xf]  ;;  %v312_v7 = vld [vmem:[#allocation2 + $0x18] sm:$0xff]   ;;  %v313_v8 = vld [vmem:[#allocation2 + $0x20] sm:$0xff]  }
  0x16   :  { %274 = vmatpush3.bf16.msra.mxu0 %v307_v1  ;;  %282 = vmatpush3.bf16.msra.mxu1 %v309_v3  ;;  %v314_v9 = vld [vmem:[#allocation2 + $0x28] sm:$0xff]   ;;  %v315_v10 = vld [vmem:[#allocation2 + $0x30] sm:$0xff]   ;;  %v316_v11 = vld [vmem:[#allocation2 + $0x38] sm:$0xff]  }
  0x17   :  { %275 = vmatprep.subr.bf16.mxu0 %v368_v0  ;;  %283 = vmatprep.subr.bf16.mxu1 %v368_v0  ;;  %v250_v12 = vld [vmem:[%s450_s2] ss:$0 sm:$0xff]  ;;  %s370_s2 = smov [#allocation5]  }
  0x18   :  { %v251_v14 = vld [vmem:[%s451_s3] ss:$0 sm:$0xff]  ;;  %s238_s20 = sshll.u32 %s370_s2, 4  ;;  %s239_s20 = int_to_ptr.vmem [resolvable:$true] %s238_s20 }
  0x19   :  { %v252_v23 = vld [vmem:[%s453_s5] ss:$0 sm:$0xff]  ;;  %s339_s3 = scalar_lea.vmem %s239_s20, 128  ;;  %p344_p9 = scmp.lt.s32.totalorder %s239_s20, %s239_s20 }
  0x1a   :  { %276 = vmatpush3.bf16.msra.mxu0 %v308_v2  ;;  %284 = vmatpush3.bf16.msra.mxu1 %v310_v4  ;;  %p340_p8 = scmp.ne.s32.totalorder %s239_s20, %s339_s3  ;;  %p345_p10 = scmp.lt.s32.totalorder %s339_s3, %s339_s3 }
  0x1b   :  { %285 = vmatprep.subr.bf16.mxu1 %v368_v0 }
  0x1c   :  { %p346_p11 = por %p345_p10, %p344_p9 }
  0x1d   :  { %278 = vmatmul.mubr.msk.bf16.vlgmr.msra.gmra.mrb[0].mxu0 %vm56_vm1, %v39_v5 }
  0x1e   :  { %286 = vmatpush3.bf16.msra.mxu1 %v311_v6  ;;  %p347_p12 = pnand %p346_p11, %p340_p8 }
  0x1f   :  { %287 = vmatprep.subr.bf16.mxu1 %v368_v0 }
  0x22   :  { %288 = vmatpush3.bf16.msra.mxu1 %v312_v7 }
  0x23   :  { %289 = vmatprep.subr.bf16.mxu1 %v368_v0 }
  0x26   :  { %290 = vmatpush3.bf16.msra.mxu1 %v313_v8 }
  0x27   :  { %291 = vmatprep.subr.bf16.mxu1 %v368_v0 }
  0x2a   :  { %292 = vmatpush3.bf16.msra.mxu1 %v314_v9 }
  0x2b   :  { %293 = vmatprep.subr.bf16.mxu1 %v368_v0 }
  0x2e   :  { %294 = vmatpush3.bf16.msra.mxu1 %v315_v10 }
  0x2f   :  { %295 = vmatprep.subr.bf16.mxu1 %v368_v0 }
  0x32   :  { %296 = vmatpush3.bf16.msra.mxu1 %v316_v11 }
  0xf0   :  { %v94_v13 = vpop.f32.mrb[0].mxu0 }
  0xf1   :  { %v107_v15 = vmul.f32 %v250_v12, %v94_v13  ;;  %v279_v16 = vpop.f32.mrb[1].mxu0 }
  0xf2   :  { %v97_v17 = vpop.f32.mrb[2].mxu0 }
  0xf3   :  { %v115_v18 = vadd.f32 %v251_v14, %v107_v15  ;;  %v280_v19 = vpop.f32.mrb[3].mxu0 }
  0xf5   :  { %v117_v20 = vmul.f32 0.2, %v115_v18  ;;  %vm116_vm2 = vcmp.gt.f32.partialorder %v115_v18, 0.0 }
  0xf7   :  { %v118_v21 = vsel %vm116_vm2, %v115_v18, %v117_v20 }
  0xf8   :  { %v119_v22 = vpack.c.bf16 %v118_v21, %v118_v21 }
  0xfa   :  { %298 = vmatmul.mubr.bf16.vlgmr.msra.gmra.mrb[0].mxu1 %v119_v22 }
 0x1cd   :  { %v225_v24 = vpop.f32.mrb[0].mxu1 }
 0x1ce   :  { %v226_v25 = vadd.f32 %v252_v23, %v225_v24  ;;  %v299_v26 = vpop.f32.mrb[1].mxu1 }
 0x1cf   :  { %v228_v27 = vpop.f32.mrb[2].mxu1 }
 0x1d0   :  { %231 = vst [vmem:[#allocation5] sm:$0xff] %v226_v25  ;;  %v300_v28 = vpop.f32.mrb[3].mxu1 }
 0x1d1   :  { %350 = shalt.err (!%p347_p12)
}
 0x1d2   :  { %s351_s5 = scalar_lea.hbm %s454_s6, 128 }
 0x1d3   :  { %p352_p13 = scmp.ne.s32.totalorder %s454_s6, %s351_s5  ;;  %p355_p0 = scmp.lt.u32.totalorder %s351_s5, %s454_s6 }
 0x1d5   :  { %p357_p1 = pnand %p355_p0, %p352_p13 }
 0x1d7   :  { %360 = shalt.err (!%p357_p1)
}
 0x1d8   :  { %241 = dma.vmem_to_hbm [thread:$0]  %s239_s20, 128, %s454_s6, [#allocation4]  }
 0x1d9   :  { %363 = dma.done.wait [#allocation4], 128  }
 0x1da   :  { %364 = vsyncadd [#allocation4], 4294967168 }
 0x1db   :  { %245 = vsyncpa [#allocation3], 1 }
 0x1dc   :  { %246 = vsyncpa [#allocation4], 1 }

</bundles_post_ra>
